<compile_context>
chip_gen: v6e
topology: v6e:2x2x1
jax: 0.10.0
libtpu: 0.0.40
codegen_flags: <defaults>
</compile_context>

<pallas_src>
import numpy as np
import jax
import jax.numpy as jnp
from jax.experimental import pallas as pl
from jax.experimental.pallas import tpu as pltpu


# ----------------------------------------------------------------------------
# Registered Gaussian 5x5 depthwise kernel buffer (unused in forward(); built
# to mirror __init__ faithfully).
# ----------------------------------------------------------------------------
def make_gauss_kernel_buffer():
    ksize = 5
    half = (ksize - 1) * 0.5
    sigma = 0.3 * (half - 1) + 0.8
    x = np.arange(-half, half + 1)
    x = np.exp(-np.square(x / sigma) / 2)
    x = np.outer(x, x)
    x = x / x.sum()
    kernel = np.zeros((3, 3, ksize, ksize), dtype=np.float32)
    for i in range(3):
        kernel[i, i] = x
    return jnp.asarray(kernel)


# ----------------------------------------------------------------------------
# Pallas kernel: SPB batch samples per grid step, lane-dense output.
# ----------------------------------------------------------------------------
def _sample_kernel(patch_ref, wy_ref, wxt_ref, out_ref):
    # patch_ref : (SPB, C, Hin, Win)
    # wy_ref    : (SPB, Hout, Hin)
    # wxt_ref   : (SPB, Win, Wout)
    # out_ref   : (SPB, Hout, (C+1)*Wout)     last block-of-Wout lanes = mask
    SPB, C, Hin, Win = patch_ref.shape
    Wout = wxt_ref.shape[2]

    # Samples statically unrolled (SPB is tiny: 1-2); keeps everything visible
    # to the LLO scheduler and avoids per-grid-step pipeline overhead.
    for n in range(SPB):
        wy = wy_ref[n]                          # (Hout, Hin)
        wxt = wxt_ref[n]                        # (Win, Wout)

        # First contraction (over Win), per channel, statically unrolled.
        pieces = [
            jnp.dot(patch_ref[n, c], wxt, preferred_element_type=jnp.float32)
            for c in range(C)                   # each (Hin, Wout)
        ]
        # Analytic mask: grid_sample of an all-ones patch == Wy @ ones @ WxT
        #              == rowsum(Wy) (outer) colsum(WxT).
        # Appending broadcast(colsum(WxT)) here makes the second matmul
        # produce it directly in the last Wout lanes — no ones-channel DMA.
        wx_sum = jnp.sum(wxt, axis=0, keepdims=True)            # (1, Wout)
        pieces.append(jnp.broadcast_to(wx_sum, (Hin, Wout)))
        t_aug = jnp.concatenate(pieces, axis=-1)                 # (Hin, (C+1)*Wout)

        # Second contraction (over Hin): single 128-lane-wide MXU matmul.
        res = jnp.dot(wy, t_aug, preferred_element_type=jnp.float32)

        # torch.clamp(adv_batch_t, 0, 1); no-op on the mask block.
        out_ref[n] = jnp.clip(res, 0.0, 1.0).astype(out_ref.dtype)


def _pallas_grid_sample_separable(adv_batch, wy, wxt, *,
                                  operand_dtype=jnp.float32,
                                  out_dtype=jnp.float32):
    """adv_batch: (SBS, C, Hin, Win); wy: (SBS, Hout, Hin); wxt: (SBS, Win, Wout).

    Returns (SBS, Hout, (C+1)*Wout) with channel-major lane blocks; the last
    Wout lanes of every row hold the resampled mask."""
    SBS, C, Hin, Win = adv_batch.shape
    Hout = wy.shape[1]
    Wout = wxt.shape[2]

    # Collapse the grid (per-step pipeline overhead dominates at these sizes),
    # but keep 2 grid steps when SBS is even so the "parallel" axis can still
    # be sharded across the two TensorCores on v7x megacore.
    nblk = 2 if (SBS >= 2 and SBS % 2 == 0) else 1
    spb = SBS // nblk

    return pl.pallas_call(
        _sample_kernel,
        out_shape=jax.ShapeDtypeStruct((SBS, Hout, (C + 1) * Wout), out_dtype),
        grid_spec=pltpu.PrefetchScalarGridSpec(
            num_scalar_prefetch=0,
            grid=(nblk,),
            in_specs=[
                pl.BlockSpec((spb, C, Hin, Win), lambda n: (n, 0, 0, 0)),
                pl.BlockSpec((spb, Hout, Hin), lambda n: (n, 0, 0)),
                pl.BlockSpec((spb, Win, Wout), lambda n: (n, 0, 0)),
            ],
            out_specs=pl.BlockSpec((spb, Hout, (C + 1) * Wout), lambda n: (n, 0, 0)),
        ),
        compiler_params=pltpu.CompilerParams(
            dimension_semantics=("parallel",)),
    )(adv_batch.astype(operand_dtype),
      wy.astype(operand_dtype),
      wxt.astype(operand_dtype))


# ----------------------------------------------------------------------------
# Bilinear weight matrices for grid_sample(align_corners=False, padding='zeros')
# ----------------------------------------------------------------------------
def _bilinear_weight_matrix(coord, size):
    """coord: (SBS, L) fractional input-pixel coords -> (SBS, L, size) weights.

    Out-of-range taps get zero weight (== padding_mode='zeros')."""
    c0 = jnp.floor(coord)
    frac = coord - c0
    i0 = c0.astype(jnp.int32)
    i1 = i0 + 1
    w0 = 1.0 - frac
    w1 = frac
    # one_hot yields an all-zero row for out-of-range indices -> zero padding.
    oh0 = jax.nn.one_hot(i0, size, dtype=coord.dtype)
    oh1 = jax.nn.one_hot(i1, size, dtype=coord.dtype)
    return w0[..., None] * oh0 + w1[..., None] * oh1


def _bilinear_weight_matrix_T(coord, size):
    """Same weights but built with the tap axis leading: (SBS, size, L).

    Used for WxT so the wrapper never has to transpose (SBS, W_img, Win) in
    HBM before the kernel."""
    c0 = jnp.floor(coord)
    frac = coord - c0
    i0 = c0.astype(jnp.int32)                                   # (SBS, L)
    i1 = i0 + 1
    w0 = 1.0 - frac
    w1 = frac
    taps = jnp.arange(size, dtype=jnp.int32)[None, :, None]     # (1, size, 1)
    m0 = (taps == i0[:, None, :]).astype(coord.dtype)           # (SBS, size, L)
    m1 = (taps == i1[:, None, :]).astype(coord.dtype)
    # Out-of-range i0/i1 match no tap -> zero column (padding_mode='zeros').
    return m0 * w0[:, None, :] + m1 * w1[:, None, :]


# ----------------------------------------------------------------------------
# Affine-grid + grid-sample weight construction (shared by wrapper & tests).
# ----------------------------------------------------------------------------
def _compute_sampling_weights(lab_batch, img_size, Hin, Win, *,
                              scale, rand_loc, lc_scale, rng_key):
    """Returns Wy: (SBS, H_img, Hin) and WxT: (SBS, Win, W_img), float32."""
    lab_batch = jnp.asarray(lab_batch, jnp.float32)
    x1, y1, x2, y2 = lab_batch[:, 0], lab_batch[:, 1], lab_batch[:, 2], lab_batch[:, 3]
    cx, cy = (x1 + x2) * 0.5, (y1 + y2) * 0.5
    bw, bh = x2 - x1, y2 - y1

    SBS = lab_batch.shape[0]
    H_img, W_img = int(img_size[0]), int(img_size[1])

    sc = scale * jnp.sqrt(bw * bw + bh * bh)
    target_x, target_y = cx, cy
    if rand_loc:
        # torch .uniform_(-lc, lc) replaced with jax.random (same distribution,
        # different RNG stream).
        k1, k2 = jax.random.split(rng_key)
        target_x = target_x + bw * jax.random.uniform(k1, (SBS,), minval=-lc_scale, maxval=lc_scale)
        target_y = target_y + bh * jax.random.uniform(k2, (SBS,), minval=-lc_scale, maxval=lc_scale)

    tx = -(target_x - W_img / 2) * 2
    ty = -(target_y - H_img / 2) * 2

    # F.affine_grid(align_corners=False): normalized output coords at pixel centers.
    xn = (2.0 * jnp.arange(W_img, dtype=jnp.float32) + 1.0) / W_img - 1.0
    yn = (2.0 * jnp.arange(H_img, dtype=jnp.float32) + 1.0) / H_img - 1.0
    gx = (W_img / sc)[:, None] * xn[None, :] + (tx / sc)[:, None]   # (SBS, W_img)
    gy = (H_img / sc)[:, None] * yn[None, :] + (ty / sc)[:, None]   # (SBS, H_img)

    # grid_sample unnormalization (align_corners=False): ix = (g+1)/2*size - 0.5
    ix = (gx + 1.0) * 0.5 * Win - 0.5
    iy = (gy + 1.0) * 0.5 * Hin - 0.5

    Wy = _bilinear_weight_matrix(iy, Hin)        # (SBS, H_img, Hin)
    WxT = _bilinear_weight_matrix_T(ix, Win)     # (SBS, Win, W_img)
    return Wy, WxT


# ----------------------------------------------------------------------------
# PatchTransformer.forward (adv_patch given -> forward_muti_class_patch path)
# ----------------------------------------------------------------------------
def patch_transformer_forward(lab_batch, img_size, lab, adv_patch, *,
                              scale=0.2, rand_loc=True, lc_scale=0.1,
                              patch_type='square', rng_key=None,
                              operand_dtype=jnp.float32):
    """Returns (adv_batch_t, msk_batch_t), both (SBS, C, H_img, W_img) float32."""
    assert patch_type == 'square'  # TODO(synk): 'round' (circular) mask not implemented here.
    SBS = lab_batch.shape[0]
    _, C, Hin, Win = adv_patch.shape
    H_img, W_img = int(img_size[0]), int(img_size[1])

    adv_batch = adv_patch[lab].astype(jnp.float32)               # (SBS, C, Hin, Win)

    Wy, WxT = _compute_sampling_weights(
        lab_batch, img_size, Hin, Win,
        scale=scale, rand_loc=rand_loc, lc_scale=lc_scale, rng_key=rng_key)

    out = _pallas_grid_sample_separable(adv_batch, Wy, WxT,
                                        operand_dtype=operand_dtype)
    # (SBS, H_img, (C+1)*W_img) -> (SBS, C+1, H_img, W_img)
    # TODO(synk): at production (W_img % 128 == 0) emit NCHW directly from the
    # kernel to delete this extra HBM round trip of the output.
    out = out.reshape(SBS, H_img, C + 1, W_img).transpose(0, 2, 1, 3)

    adv_batch_t = out[:, :C]                                     # clamped in-kernel
    # All mask channels are identical; broadcast only to match the module's shape.
    msk_batch_t = jnp.broadcast_to(out[:, C:C + 1], (SBS, C, H_img, W_img))
    return adv_batch_t, msk_batch_t


# TODO(synk): forward_bbox_patch branch (adv_patch is None) reuses the same
# sampler with a zero 3x300x300 patch + torch.any over the batch; not exercised here.


if __name__ == "__main__":
    key = jax.random.PRNGKey(0)
    k_patch, k_cxy, k_wh, k_loc = jax.random.split(key, 4)

    num_classes, C, Hin, Win = 2, 3, 16, 16
    SBS = 4
    img_size = (32, 32)

    _ = make_gauss_kernel_buffer()  # registered buffer, unused in forward

    adv_patch = jax.random.uniform(k_patch, (num_classes, C, Hin, Win), dtype=jnp.float32)

    # boxes in x1y1x2y2 inside the 32x32 image
    cxy = jax.random.uniform(k_cxy, (SBS, 2), minval=10.0, maxval=22.0)
    wh = jax.random.uniform(k_wh, (SBS, 2), minval=6.0, maxval=12.0)
    lab_batch = jnp.concatenate([cxy - wh / 2, cxy + wh / 2], axis=1)      # (SBS, 4)
    lab = jnp.array([0, 1, 0, 1], dtype=jnp.int32)

    adv_t, msk_t = patch_transformer_forward(
        lab_batch, img_size, lab, adv_patch,
        scale=0.2, rand_loc=True, lc_scale=0.1, rng_key=k_loc)
    jax.block_until_ready((adv_t, msk_t))

    assert adv_t.shape == (SBS, C, img_size[0], img_size[1])
    assert msk_t.shape == (SBS, C, img_size[0], img_size[1])

    # Plain-JAX cross-check of the separable resample: rebuild the exact same
    # Wy/WxT (same rng key -> same draw) and compare against a dense einsum.
    adv_b = adv_patch[lab].astype(jnp.float32)
    Wy_r, WxT_r = _compute_sampling_weights(
        lab_batch, img_size, Hin, Win,
        scale=0.2, rand_loc=True, lc_scale=0.1, rng_key=k_loc)
    # out[n,c,h,w] = sum_ij Wy[n,h,i] * patch[n,c,i,j] * WxT[n,j,w]
    ref_adv = jnp.clip(jnp.einsum('nhi,ncij,njw->nchw', Wy_r, adv_b, WxT_r), 0.0, 1.0)
    # mask = Wy @ ones @ WxT == rowsum(Wy) outer colsum(WxT)
    ref_msk = jnp.einsum('nhi,njw->nhw', Wy_r, WxT_r)[:, None]
    assert jnp.allclose(adv_t, ref_adv, atol=1e-5), "adv mismatch"
    assert jnp.allclose(msk_t[:, :1], ref_msk, atol=1e-5), "mask mismatch"

    print("KERNEL_OK")
</pallas_src>

<mosaic_0001>
module attributes {stable_mosaic.version = 11 : i64} {
  func.func @_sample_kernel(%arg0: i32, %arg1: memref<2x3x16x16xf32, #tpu.memory_space<vmem>>, %arg2: memref<2x32x16xf32, #tpu.memory_space<vmem>>, %arg3: memref<2x16x32xf32, #tpu.memory_space<vmem>>, %arg4: memref<2x32x128xf32, #tpu.memory_space<vmem>>) attributes {dimension_semantics = [#tpu.dimension_semantics<parallel>], iteration_bounds = array<i64: 2>, scalar_prefetch = 0 : i64, scratch_operands = 0 : i64, tpu.core_type = #tpu.core_type<tc>, window_params = [{transform_indices = @transform_0, window_bounds = array<i64: 2, 3, 16, 16>}, {transform_indices = @transform_1, window_bounds = array<i64: 2, 32, 16>}, {transform_indices = @transform_2, window_bounds = array<i64: 2, 16, 32>}, {transform_indices = @transform_3, window_bounds = array<i64: 2, 32, 128>}]} {
    %c0 = arith.constant 0 : index
    %c0_0 = arith.constant 0 : index
    %c0_1 = arith.constant 0 : index
    %0 = vector.load %arg2[%c0, %c0_0, %c0_1] : memref<2x32x16xf32, #tpu.memory_space<vmem>>, vector<1x32x16xf32>
    %1 = vector.shape_cast %0 : vector<1x32x16xf32> to vector<32x16xf32>
    %c0_2 = arith.constant 0 : index
    %c0_3 = arith.constant 0 : index
    %c0_4 = arith.constant 0 : index
    %2 = vector.load %arg3[%c0_2, %c0_3, %c0_4] : memref<2x16x32xf32, #tpu.memory_space<vmem>>, vector<1x16x32xf32>
    %3 = vector.shape_cast %2 : vector<1x16x32xf32> to vector<16x32xf32>
    %c0_5 = arith.constant 0 : index
    %c0_6 = arith.constant 0 : index
    %c0_7 = arith.constant 0 : index
    %c0_8 = arith.constant 0 : index
    %4 = vector.load %arg1[%c0_5, %c0_6, %c0_7, %c0_8] : memref<2x3x16x16xf32, #tpu.memory_space<vmem>>, vector<1x1x16x16xf32>
    %5 = vector.shape_cast %4 : vector<1x1x16x16xf32> to vector<16x16xf32>
    %cst = arith.constant dense<0.000000e+00> : vector<16x32xf32>
    %6 = tpu.matmul %5, %3, %cst {dimension_numbers = #tpu.dot_dimension_numbers<[1], [0], [0], [1], [0, 0, 1, 1], [], []>} : vector<16x16xf32>, vector<16x32xf32>, vector<16x32xf32> -> vector<16x32xf32>
    %c0_9 = arith.constant 0 : index
    %c1 = arith.constant 1 : index
    %c0_10 = arith.constant 0 : index
    %c0_11 = arith.constant 0 : index
    %7 = vector.load %arg1[%c0_9, %c1, %c0_10, %c0_11] : memref<2x3x16x16xf32, #tpu.memory_space<vmem>>, vector<1x1x16x16xf32>
    %8 = vector.shape_cast %7 : vector<1x1x16x16xf32> to vector<16x16xf32>
    %cst_12 = arith.constant dense<0.000000e+00> : vector<16x32xf32>
    %9 = tpu.matmul %8, %3, %cst_12 {dimension_numbers = #tpu.dot_dimension_numbers<[1], [0], [0], [1], [0, 0, 1, 1], [], []>} : vector<16x16xf32>, vector<16x32xf32>, vector<16x32xf32> -> vector<16x32xf32>
    %c0_13 = arith.constant 0 : index
    %c2 = arith.constant 2 : index
    %c0_14 = arith.constant 0 : index
    %c0_15 = arith.constant 0 : index
    %10 = vector.load %arg1[%c0_13, %c2, %c0_14, %c0_15] : memref<2x3x16x16xf32, #tpu.memory_space<vmem>>, vector<1x1x16x16xf32>
    %11 = vector.shape_cast %10 : vector<1x1x16x16xf32> to vector<16x16xf32>
    %cst_16 = arith.constant dense<0.000000e+00> : vector<16x32xf32>
    %12 = tpu.matmul %11, %3, %cst_16 {dimension_numbers = #tpu.dot_dimension_numbers<[1], [0], [0], [1], [0, 0, 1, 1], [], []>} : vector<16x16xf32>, vector<16x32xf32>, vector<16x32xf32> -> vector<16x32xf32>
    %cst_17 = arith.constant dense<0.000000e+00> : vector<32xf32>
    %13 = vector.multi_reduction <add>, %3, %cst_17 [0] : vector<16x32xf32> to vector<32xf32>
    %14 = vector.shape_cast %13 : vector<32xf32> to vector<1x32xf32>
    %15 = vector.shape_cast %14 : vector<1x32xf32> to vector<1x32xf32>
    %16 = vector.broadcast %15 : vector<1x32xf32> to vector<16x32xf32>
    %17 = tpu.concatenate %6, %9, %12, %16 in 1 : vector<16x32xf32>, vector<16x32xf32>, vector<16x32xf32>, vector<16x32xf32> -> vector<16x128xf32>
    %cst_18 = arith.constant dense<0.000000e+00> : vector<32x128xf32>
    %18 = tpu.matmul %1, %17, %cst_18 {dimension_numbers = #tpu.dot_dimension_numbers<[1], [0], [0], [1], [0, 0, 1, 1], [], []>} : vector<32x16xf32>, vector<16x128xf32>, vector<32x128xf32> -> vector<32x128xf32>
    %cst_19 = arith.constant 0.000000e+00 : f32
    %cst_20 = arith.constant 1.000000e+00 : f32
    %19 = vector.broadcast %cst_19 : f32 to vector<32x128xf32>
    %20 = arith.maximumf %19, %18 : vector<32x128xf32>
    %21 = vector.broadcast %cst_20 : f32 to vector<32x128xf32>
    %22 = arith.minimumf %21, %20 : vector<32x128xf32>
    %c0_21 = arith.constant 0 : index
    %c0_22 = arith.constant 0 : index
    %c0_23 = arith.constant 0 : index
    %23 = vector.load %arg4[%c0_21, %c0_22, %c0_23] : memref<2x32x128xf32, #tpu.memory_space<vmem>>, vector<1x32x128xf32>
    %24 = vector.shape_cast %23 : vector<1x32x128xf32> to vector<32x128xf32>
    %25 = vector.shape_cast %22 : vector<32x128xf32> to vector<1x32x128xf32>
    tpu.vector_store %arg4[%c0_21, %c0_22, %c0_23], %25 {strides = array<i32>} : memref<2x32x128xf32, #tpu.memory_space<vmem>>, vector<1x32x128xf32>,
    %c1_24 = arith.constant 1 : index
    %c0_25 = arith.constant 0 : index
    %c0_26 = arith.constant 0 : index
    %26 = vector.load %arg2[%c1_24, %c0_25, %c0_26] : memref<2x32x16xf32, #tpu.memory_space<vmem>>, vector<1x32x16xf32>
    %27 = vector.shape_cast %26 : vector<1x32x16xf32> to vector<32x16xf32>
    %c1_27 = arith.constant 1 : index
    %c0_28 = arith.constant 0 : index
    %c0_29 = arith.constant 0 : index
    %28 = vector.load %arg3[%c1_27, %c0_28, %c0_29] : memref<2x16x32xf32, #tpu.memory_space<vmem>>, vector<1x16x32xf32>
    %29 = vector.shape_cast %28 : vector<1x16x32xf32> to vector<16x32xf32>
    %c1_30 = arith.constant 1 : index
    %c0_31 = arith.constant 0 : index
    %c0_32 = arith.constant 0 : index
    %c0_33 = arith.constant 0 : index
    %30 = vector.load %arg1[%c1_30, %c0_31, %c0_32, %c0_33] : memref<2x3x16x16xf32, #tpu.memory_space<vmem>>, vector<1x1x16x16xf32>
    %31 = vector.shape_cast %30 : vector<1x1x16x16xf32> to vector<16x16xf32>
    %cst_34 = arith.constant dense<0.000000e+00> : vector<16x32xf32>
    %32 = tpu.matmul %31, %29, %cst_34 {dimension_numbers = #tpu.dot_dimension_numbers<[1], [0], [0], [1], [0, 0, 1, 1], [], []>} : vector<16x16xf32>, vector<16x32xf32>, vector<16x32xf32> -> vector<16x32xf32>
    %c1_35 = arith.constant 1 : index
    %c1_36 = arith.constant 1 : index
    %c0_37 = arith.constant 0 : index
    %c0_38 = arith.constant 0 : index
    %33 = vector.load %arg1[%c1_35, %c1_36, %c0_37, %c0_38] : memref<2x3x16x16xf32, #tpu.memory_space<vmem>>, vector<1x1x16x16xf32>
    %34 = vector.shape_cast %33 : vector<1x1x16x16xf32> to vector<16x16xf32>
    %cst_39 = arith.constant dense<0.000000e+00> : vector<16x32xf32>
    %35 = tpu.matmul %34, %29, %cst_39 {dimension_numbers = #tpu.dot_dimension_numbers<[1], [0], [0], [1], [0, 0, 1, 1], [], []>} : vector<16x16xf32>, vector<16x32xf32>, vector<16x32xf32> -> vector<16x32xf32>
    %c1_40 = arith.constant 1 : index
    %c2_41 = arith.constant 2 : index
    %c0_42 = arith.constant 0 : index
    %c0_43 = arith.constant 0 : index
    %36 = vector.load %arg1[%c1_40, %c2_41, %c0_42, %c0_43] : memref<2x3x16x16xf32, #tpu.memory_space<vmem>>, vector<1x1x16x16xf32>
    %37 = vector.shape_cast %36 : vector<1x1x16x16xf32> to vector<16x16xf32>
    %cst_44 = arith.constant dense<0.000000e+00> : vector<16x32xf32>
    %38 = tpu.matmul %37, %29, %cst_44 {dimension_numbers = #tpu.dot_dimension_numbers<[1], [0], [0], [1], [0, 0, 1, 1], [], []>} : vector<16x16xf32>, vector<16x32xf32>, vector<16x32xf32> -> vector<16x32xf32>
    %cst_45 = arith.constant dense<0.000000e+00> : vector<32xf32>
    %39 = vector.multi_reduction <add>, %29, %cst_45 [0] : vector<16x32xf32> to vector<32xf32>
    %40 = vector.shape_cast %39 : vector<32xf32> to vector<1x32xf32>
    %41 = vector.shape_cast %40 : vector<1x32xf32> to vector<1x32xf32>
    %42 = vector.broadcast %41 : vector<1x32xf32> to vector<16x32xf32>
    %43 = tpu.concatenate %32, %35, %38, %42 in 1 : vector<16x32xf32>, vector<16x32xf32>, vector<16x32xf32>, vector<16x32xf32> -> vector<16x128xf32>
    %cst_46 = arith.constant dense<0.000000e+00> : vector<32x128xf32>
    %44 = tpu.matmul %27, %43, %cst_46 {dimension_numbers = #tpu.dot_dimension_numbers<[1], [0], [0], [1], [0, 0, 1, 1], [], []>} : vector<32x16xf32>, vector<16x128xf32>, vector<32x128xf32> -> vector<32x128xf32>
    %cst_47 = arith.constant 0.000000e+00 : f32
    %cst_48 = arith.constant 1.000000e+00 : f32
    %45 = vector.broadcast %cst_47 : f32 to vector<32x128xf32>
    %46 = arith.maximumf %45, %44 : vector<32x128xf32>
    %47 = vector.broadcast %cst_48 : f32 to vector<32x128xf32>
    %48 = arith.minimumf %47, %46 : vector<32x128xf32>
    %c1_49 = arith.constant 1 : index
    %c0_50 = arith.constant 0 : index
    %c0_51 = arith.constant 0 : index
    %49 = vector.load %arg4[%c1_49, %c0_50, %c0_51] : memref<2x32x128xf32, #tpu.memory_space<vmem>>, vector<1x32x128xf32>
    %50 = vector.shape_cast %49 : vector<1x32x128xf32> to vector<32x128xf32>
    %51 = vector.shape_cast %48 : vector<32x128xf32> to vector<1x32x128xf32>
    tpu.vector_store %arg4[%c1_49, %c0_50, %c0_51], %51 {strides = array<i32>} : memref<2x32x128xf32, #tpu.memory_space<vmem>>, vector<1x32x128xf32>,
    return
  }
  func.func @transform_0(%arg0: i32) -> (i32, i32, i32, i32) {
    %c0_i32 = arith.constant 0 : i32
    %c0_i32_0 = arith.constant 0 : i32
    %c0_i32_1 = arith.constant 0 : i32
    %c0_i32_2 = arith.constant 0 : i32
    return %arg0, %c0_i32, %c0_i32_0, %c0_i32_1 : i32, i32, i32, i32
  }
  func.func @transform_1(%arg0: i32) -> (i32, i32, i32) {
    %c0_i32 = arith.constant 0 : i32
    %c0_i32_0 = arith.constant 0 : i32
    %c0_i32_1 = arith.constant 0 : i32
    return %arg0, %c0_i32, %c0_i32_0 : i32, i32, i32
  }
  func.func @transform_2(%arg0: i32) -> (i32, i32, i32) {
    %c0_i32 = arith.constant 0 : i32
    %c0_i32_0 = arith.constant 0 : i32
    %c0_i32_1 = arith.constant 0 : i32
    return %arg0, %c0_i32, %c0_i32_0 : i32, i32, i32
  }
  func.func @transform_3(%arg0: i32) -> (i32, i32, i32) {
    %c0_i32 = arith.constant 0 : i32
    %c0_i32_0 = arith.constant 0 : i32
    %c0_i32_1 = arith.constant 0 : i32
    return %arg0, %c0_i32, %c0_i32_0 : i32, i32, i32
  }
}

</mosaic_0001>

<bundles_post_ra>
// kernel: tpu_custom_call.1
= control target key start
LH: loop header
LB: loop body
LE: loop exit
PB: predicated region body
PF: predicated region fallthrough
CT: control target
= control target key end

     0   :  { %8 = vsyncpa [#allocation3], 0  ;;  %s1778_s0 = inlined_call_operand.vmem [shape: f32[4,3,16,16], index: 0, kind: input, shape index: {}]   ;;  %s1779_s1 = inlined_call_operand.vmem [shape: f32[4,32,16], index: 1, kind: input, shape index: {}]   ;;  %s1780_s2 = inlined_call_operand.hbm [shape: f32[4,16,32], index: 2, kind: input, shape index: {}]   ;;  %s1781_s3 = inlined_call_operand.hbm [shape: f32[4,32,128], index: 3, kind: output, shape index: {}]  }
   0x1   :  { %10 = vsyncpa [#allocation3 + $0x1], 0 }
   0x2   :  { %11 = vsyncpa [#allocation4], 0 }
   0x3   :  { %13 = vsyncpa [#allocation4 + $0x1], 0  ;;  %s1505_s12 = smov 0   ;;  %s1507_s13 = smov 0  }
   0x4   :  { %s1509_s14 = smov 0   ;;  %s1511_s15 = smov 0  }
   0x5 LB: > { %s1526_s16 = sadd.s32 4294967295, %s1474_s15   ;;  %s1164_s17 = sadd.s32 4294967294, %s1474_s15   ;;  %s1474_s15 = sphi %s1511_s15, %s1796_s15   ;;  %s1470_s14 = sphi %s1509_s14, %s1795_s14   ;;  %s1466_s13 = sphi %s1507_s13, %s1794_s13   ;;  %s1462_s12 = sphi %s1505_s12, %s1793_s12  }
   0x6   : > { %s1530_s18 = sadd.s32 1, %s1474_s15   ;;  %s78_s19 = sadd.s32 1, %s1470_s14 }
   0x7   : > { %s75_s20 = ssub.s32 %s1474_s15, %s1530_s18  ;;  %p85_p0 = scmp.ne.s32.totalorder %s1470_s14, %s1466_s13 }
   0x8   : > { %p76_p1 = scmp.eq.s32.totalorder %s75_s20, 0  ;;  %p86_p2 = scmp.eq.s32.totalorder %s1474_s15, 0 }
   0x9   : > { %p91_p3 = scmp.ne.s32.totalorder %s1466_s13, %s1462_s12  ;;  %p92_p4 = scmp.eq.s32.totalorder %s1526_s16, 0 }
   0xa   : > { %s1542_s21 = scalar_select %p76_p1, %s1470_s14, %s78_s19  }
   0xb   : > { %p1544_p5 = por %p86_p2, %p85_p0  ;;  %p1548_p6 = por %p92_p4, %p91_p3 }
   0xc   : > { %p115_p7 = scmp.eq.s32.totalorder %s1526_s16, 1  ;;  %p121_p8 = scmp.eq.s32.totalorder %s1164_s17, 1 }
   0xd   : > { %s1785_s23 = scalar_select %p1548_p6, 1, 0 }
   0xe   : > { %p1341_p10 = scmp.lt.s32.totalorder %s1474_s15, 2  ;;  %p1555_p11 = por %p115_p7, %p85_p0 }
   0xf   : > { %p1559_p12 = por %p121_p8, %p91_p3  ;;  %s161_s26 = sand.u32 1, %s1470_s14  }
  0x10   : > { %s1786_s24 = scalar_select %p1555_p11, 1, 0 }
  0x11   : > { %s1787_s25 = scalar_select %p1559_p12, 1, 0 }
  0x12   : > { %s1226_s27 = sshll.u32 %s1474_s15, 9  ;;  %s1167_s28 = sshll.u32 %s161_s26, 5 }
  0x13   : > { %s1568_s4 = scalar_lea.hbm %s1780_s2, %s1226_s27  ;;  %s165_s5 = scalar_lea.vmem [#allocation2], %s1167_s28 }
  0x14   : > { %s173_s6 = sshll.u32 %s165_s5, 4  ;;  %p1572_p13 = pnand %p1341_p10, %p1544_p5  ;;  %s1576_s6 = int_to_ptr.vmem [resolvable:$true] %s173_s6 }
  0x15   : > { %s1578_s8 = scalar_lea.sflag [#allocation3], %s161_s26  ;;  %s1382_s9 = scalar_lea.hbm %s1568_s4, 512 }
  0x16   : > { %p1383_p0 = scmp.ne.s32.totalorder %s1568_s4, %s1382_s9  ;;  %p1384_p1 = pneg %p1572_p13 }
  0x17   : > { %s1387_s17 = scalar_lea.hbm %s1780_s2, 1024  ;;  %p1388_p4 = scmp.lt.s32.totalorder %s1568_s4, %s1780_s2 }
  0x18   : > { %p1385_p2 = pnand %p1384_p1, %p1383_p0  ;;  %p1389_p5 = scmp.lt.s32.totalorder %s1387_s17, %s1382_s9 }
  0x1a   : > { %p1386_p3 = pneg %p1385_p2  ;;  %p1390_p7 = por %p1389_p5, %p1388_p4 }
  0x1c   : > { %p1391_p8 = pnand %p1390_p7, %p1386_p3 }
  0x1e   : > { %1394 = shalt.err (!%p1391_p8)
}
  0x1f   : > { %s1395_s22 = scalar_lea.vmem %s1576_s6, 512  ;;  %s1476_s26 = smov [#allocation2]  }
  0x20   : > { %p1396_p10 = scmp.ne.s32.totalorder %s1576_s6, %s1395_s22  ;;  %s1400_s27 = sshll.u32 %s1476_s26, 4  ;;  %s1401_s27 = int_to_ptr.vmem [resolvable:$false] %s1400_s27 }
  0x21   : > { %s1402_s28 = scalar_lea.vmem %s1401_s27, 1024  ;;  %p1403_p2 = scmp.lt.s32.totalorder %s1576_s6, %s1401_s27 }
  0x22   : > { %p1398_p9 = pnand %p1396_p10, %p1384_p1  ;;  %p1404_p12 = scmp.lt.s32.totalorder %s1402_s28, %s1395_s22 }
  0x24   : > { %p1399_p0 = pneg %p1398_p9  ;;  %p1405_p11 = por %p1404_p12, %p1403_p2 }
  0x26   : > { %p1406_p6 = pnand %p1405_p11, %p1399_p0 }
  0x28   : > { %1409 = shalt.err (!%p1406_p6)
}
  0x29   : > { %s1477_s29 = smov 128   ;;  %s1478_s30 = smov 8  }
  0x2a   : > { %1336 = dma.hbm_to_vmem [thread:$0]  (!%p1572_p13), %s1568_s4, 512, %s1576_s6, %s1578_s8, %s1477_s29, %s1477_s29, %s1478_s30  }
  0x2b   : > { %p1171_p9 = scmp.ge.s32.totalorder %s1474_s15, 1  ;;  %p181_p1 = scmp.lt.s32.totalorder %s1474_s15, 3 }
  0x2d   : > { %p182_p3 = pnand %p1171_p9, %p181_p1 }
  0x2e   : > { %s1602_s5 = sand.u32 (!%p182_p3), 1, %s1466_s13   ;;  %p1789_p6 = scmp.ne.s32.totalorder (!%p182_p3), %s1785_s23, 0 }
  0x2f   : > { %185 = sbr.rel (%p182_p3) target bundleno = 927 (0x39f), region = 32  ;;  %s1172_s9 = sshll.u32 (!%p182_p3), %s1602_s5, 5 }
  0x30   : > { %s188_s10 = scalar_lea.sflag (!%p182_p3), [#allocation3], %s1602_s5  ;;  %s1606_s11 = scalar_lea.vmem (!%p182_p3), [#allocation2], %s1172_s9 }
  0x34   : > { %1453 = dma.done.wait (%p1789_p6), %s188_s10, 512  }
  0x35   : > { %1455 = vsyncadd (%p1789_p6), %s188_s10, 4294966784  ;;  %s1174_s4 = sshll.u32 %s1526_s16, 1  ;;  %v247_v0 = vld [vmem:[%s1606_s11 + $0x8] sm:$0xff]  ;;  %v246_v1 = vld [vmem:[%s1606_s11] sm:$0xff]  ;;  %vm250_vm0 = vcmask 130048   ;;  %vm500_vm1 = vcmask 261120  }
  0x36   : > { %p227_p11 = scmp.lt.s32.totalorder %s1174_s4, 3  ;;  %1266 = vmatprep.subr.mxu1 %v247_v0  ;;  %1280 = vmatprep.subr.mxu0 %v247_v0  ;;  %v1636_v8 = vld [vmem:[%s1606_s11 + $0x18] sm:$0xff]  ;;  %v1641_v9 = vld [vmem:[%s1606_s11 + $0x10] sm:$0xff]  ;;  %v501_v14 = vsel %vm500_vm1, %v246_v1, 0.0  ;;  %v502_v15 = vsel %vm500_vm1, %v247_v0, 0.0  ;;  %s1479_s26 = smov 64  }
  0x37   : > { %1267 = vmatpush3.msra.mxu1 %v247_v0  ;;  %1281 = vmatpush3.msra.mxu0 %v247_v0  ;;  %v503_v16 = vadd.f32 %v502_v15, %v501_v14  ;;  %s1480_s27 = smov 32   ;;  %s1481_s28 = smov 96   ;;  %vm532_vm2 = vcmask 523264   ;;  %vm535_vm3 = vcmask 785408   ;;  %v907_v50 = vsel %vm500_vm1, %v1641_v9, 0.0 }
  0x38   : > { %s1798_s4 = smov (!%p227_p11, %s1174_s4), 3  ;;  %1268 = vmatprep.subr.mxu1 %v246_v1  ;;  %1282 = vmatprep.subr.mxu0 %v246_v1  ;;  %v908_v51 = vsel %vm500_vm1, %v1636_v8, 0.0  ;;  %s1173_s29 = sshll.u32 %s1602_s5, 6 }
  0x39   : > { %s1328_s6 = smul.u32 48, %s1798_s4  ;;  %1269 = vmatpush3.msra.mxu1 %v246_v1  ;;  %1283 = vmatpush3.msra.mxu0 %v246_v1  ;;  %v504_v17 = vrot.slane %v503_v16, 4  ;;  %s1227_s23 = sshll.u32 %s1798_s4, 5  ;;  %v909_v52 = vadd.f32 %v908_v51, %v907_v50 }
  0x3a   : > { %1273 = vmatprep.subr.mxu1 %v247_v0  ;;  %1297 = vmatprep.subr.mxu0 %v1636_v8  ;;  %s1663_s22 = scalar_lea.vmem %s1779_s1, %s1227_s23  ;;  %s1700_s30 = scalar_lea.vmem [#allocation5], %s1173_s29 }
  0x3b   : > { %s1621_s17 = scalar_lea.vmem %s1778_s0, %s1328_s6  ;;  %v505_v18 = vadd.f32 %v504_v17, %v503_v16  ;;  %v242_v24 = vld [vmem:[%s1663_s22] sm:$0xff]  ;;  %v243_v45 = vld [vmem:[%s1663_s22 + $0x8] sm:$0xff]  ;;  %v244_v46 = vld [vmem:[%s1663_s22 + $0x10] sm:$0xff]  ;;  %v910_v53 = vrot.slane %v909_v52, 4  ;;  %s1067_s9 = sshll.u32 %s1700_s30, 4  ;;  %s1727_s9 = int_to_ptr.vmem [resolvable:$true] %s1067_s9 }
  0x3c   : > { %v248_v2 = vld [vmem:[%s1621_s17] sm:$0xff]  ;;  %v249_v4 = vld [vmem:[%s1621_s17 + $0x8] sm:$0xff]  ;;  %v1181_v6 = vld [vmem:[%s1621_s17 + $0x10] sm:$0xff]  ;;  %s1229_s10 = sshll.u32 %s1526_s16, 10  ;;  %s1053_s7 = scalar_lea.sflag [#allocation4], %s1602_s5 }
  0x3d   : > { %v1185_v3 = vld [vmem:[%s1621_s17 + $0x20] sm:$0xff]  ;;  %1270 = vmatprep.mubr.msk.f32.mxu1 %vm250_vm0, %v248_v2  ;;  %v1186_v5 = vld [vmem:[%s1621_s17 + $0x28] sm:$0xff]  ;;  %v1182_v7 = vld [vmem:[%s1621_s17 + $0x18] sm:$0xff]  ;;  %v506_v19 = vrot.slane %v505_v18, 2  ;;  %v911_v54 = vadd.f32 %v910_v53, %v909_v52  ;;  %s1733_s6 = scalar_lea.hbm %s1781_s3, %s1229_s10  ;;  %s1410_s8 = scalar_lea.vmem %s1727_s9, 1024 }
  0x3e   : > { %1284 = vmatprep.mubr.msk.f32.mxu0 %vm250_vm0, %v1185_v3  ;;  %1271 = vmatmul.mubr.msk.f32.vlgmr.msra.gmra.mxu1 %vm250_vm0, %v249_v4  ;;  %v1199_v10 = vld [vmem:[%s1621_s17 + $0x30] sm:$0xff]  ;;  %v1200_v11 = vld [vmem:[%s1621_s17 + $0x38] sm:$0xff]  ;;  %v1203_v12 = vld [vmem:[%s1621_s17 + $0x40] sm:$0xff]  ;;  %p1411_p12 = scmp.ne.s32.totalorder %s1727_s9, %s1410_s8  ;;  %p1790_p13 = scmp.ne.s32.totalorder %s1786_s24, 0 }
  0x3f   : > { %1285 = vmatmul.mubr.msk.f32.vlgmr.msra.gmra.mxu0 %vm250_vm0, %v1186_v5  ;;  %1274 = vmatpush3.msra.mxu1 %v247_v0  ;;  %v1204_v13 = vld [vmem:[%s1621_s17 + $0x48] sm:$0xff]  ;;  %v507_v20 = vadd.f32 %v506_v19, %v505_v18  ;;  %v245_v47 = vld [vmem:[%s1663_s22 + $0x18] sm:$0xff]  ;;  %v1207_v48 = vld [vmem:[%s1621_s17 + $0x50] sm:$0xff]  ;;  %v912_v55 = vrot.slane %v911_v54, 2  ;;  %s1482_s16 = smov [#allocation5]  }
  0x40   : > { %1275 = vmatprep.subr.mxu1 %v246_v1  ;;  %1277 = vmatprep.mubr.msk.f32.mxu1 %vm250_vm0, %v1181_v6  ;;  %v1208_v49 = vld [vmem:[%s1621_s17 + $0x58] sm:$0xff]  ;;  %v1193_v63 = vld [vmem:[%s1663_s22 + $0x20] sm:$0xff]  ;;  %p1412_p4 = pnand %p1411_p12, %p1790_p13  ;;  %s1414_s17 = sshll.u32 %s1482_s16, 4  ;;  %s1415_s17 = int_to_ptr.vmem [resolvable:$false] %s1414_s17 }
  0x41   : > { %1276 = vmatpush3.msra.mxu1 %v246_v1  ;;  %1298 = vmatpush3.msra.mxu0 %v1636_v8  ;;  %v508_v25 = vrot.slane %v507_v20, 1  ;;  %v913_v58 = vadd.f32 %v912_v55, %v911_v54  ;;  %s1416_s23 = scalar_lea.vmem %s1415_s17, 2048  ;;  %p1417_p7 = scmp.lt.s32.totalorder %s1727_s9, %s1415_s17 }
  0x42   : > { %1278 = vmatmul.mubr.msk.f32.vlgmr.msra.gmra.mxu1 %vm250_vm0, %v1182_v7  ;;  %1299 = vmatprep.subr.mxu0 %v1641_v9  ;;  %p1413_p5 = pneg %p1412_p4  ;;  %p1418_p8 = scmp.lt.s32.totalorder %s1416_s23, %s1410_s8 }
  0x43   : > { %1300 = vmatpush3.msra.mxu0 %v1641_v9  ;;  %1301 = vmatprep.mubr.msk.f32.mxu0 %vm250_vm0, %v1199_v10  ;;  %v509_v28 = vadd.f32 %v508_v25, %v507_v20  ;;  %v914_v2 = vrot.slane %v913_v58, 1 }
  0x44   : > { %1302 = vmatmul.mubr.msk.f32.vlgmr.msra.gmra.mxu0 %vm250_vm0, %v1200_v11  ;;  %1304 = vmatprep.subr.mxu0 %v1636_v8  ;;  %p1419_p10 = por %p1418_p8, %p1417_p7 }
  0x45   : > { %1305 = vmatpush3.msra.mxu0 %v1636_v8  ;;  %1308 = vmatprep.mubr.msk.f32.mxu0 %vm250_vm0, %v1203_v12 }
  0x46   : > { %1306 = vmatprep.subr.mxu0 %v1641_v9  ;;  %1291 = vmatprep.mubr.msk.f32.mxu1 %vm250_vm0, %v242_v24  ;;  %p1420_p0 = pnand %p1419_p10, %p1413_p5 }
  0x47   : > { %1307 = vmatpush3.msra.mxu0 %v1641_v9 }
  0x48   : > { %1309 = vmatmul.mubr.msk.f32.vlgmr.msra.gmra.mxu0 %vm250_vm0, %v1204_v13 }
  0x49   : > { %1322 = vmatprep.mubr.msk.f32.mxu0 %vm250_vm0, %v1193_v63 }
  0xfe   : > { %v1272_v21 = vpop.f32.mrf.mxu1 }
  0xff   : > { %v1286_v22 = vpop.f32.mrf.mxu0 }
 0x100   : > { %522 = vrot.lane.b32.xlu0 %v1286_v22, %s1479_s26  ;;  %v323_v23 = vpop.f32.mrf.mxu1  ;;  %v1195_v22 = vld [vmem:[%s1663_s22 + $0x30] sm:$0xff] }
 0x101   : > { %v491_v29 = vpop.f32.mrf.mxu0 }
 0x102   : > { %v1279_v26 = vpop.f32.mrf.mxu1 }
 0x104   : > { %514 = vrot.lane.b32.xlu0 %v1279_v26, %s1480_s27  ;;  %v407_v27 = vpop.f32.mrf.mxu1  ;;  %v1670_v30 = vpop.f32.mrf.mxu0 }
 0x105   : > { %512 = vrot.lane.b32.xlu1 %v407_v27, %s1480_s27 }
 0x106   : > { %v1672_v31 = vpop.f32.mrf.mxu0 }
 0x108   : > { %520 = vrot.lane.b32.xlu0 %v491_v29, %s1479_s26  ;;  %v1310_v32 = vpop.f32.mrf.mxu0 }
 0x109   : > { %527 = vrot.lane.b32.xlu1 %v509_v28, %s1481_s28 }
 0x10a   : > { %v814_v33 = vpop.f32.mrf.mxu0 }
 0x10d   : > { %920 = vrot.lane.b32.xlu1 %v1310_v32, %s1480_s27 }
 0x111   : > { %918 = vrot.lane.b32.xlu1 %v814_v33, %s1480_s27 }
 0x172   : > { %v523_v34 = vpop.permute.xlu0 %522 }
 0x176   : > { %v515_v35 = vpop.permute.xlu0 %514 }
 0x177   : > { %v513_v36 = vpop.permute.xlu1 %512  ;;  %v531_v37 = vsel %vm500_vm1, %v1272_v21, %v515_v35  ;;  %v1194_v21 = vld [vmem:[%s1663_s22 + $0x28] sm:$0xff] }
 0x178   : > { %v530_v38 = vsel %vm500_vm1, %v323_v23, %v513_v36  ;;  %v534_v42 = vsel %vm532_vm2, %v531_v37, %v523_v34  ;;  %v1196_v23 = vld [vmem:[%s1663_s22 + $0x38] sm:$0xff] }
 0x17a   : > { %v521_v39 = vpop.permute.xlu0 %520 }
 0x17b   : > { %v533_v40 = vsel %vm532_vm2, %v530_v38, %v521_v39  ;;  %v528_v41 = vpop.permute.xlu1 %527 }
 0x17c   : > { %v537_v43 = vsel %vm535_vm3, %v534_v42, %v528_v41  ;;  %v536_v44 = vsel %vm535_vm3, %v533_v40, %v528_v41 }
 0x17d   : > { %1287 = vmatprep.subr.mxu1 %v537_v43 }
 0x17e   : > { %1288 = vmatpush3.msra.mxu1 %v537_v43 }
 0x17f   : > { %1289 = vmatprep.subr.mxu1 %v536_v44  ;;  %v921_v10 = vpop.permute.xlu1 %920 }
 0x180   : > { %1290 = vmatpush3.msra.mxu1 %v536_v44  ;;  %v937_v14 = vsel %vm500_vm1, %v1670_v30, %v921_v10 }
 0x181   : > { %1292 = vmatmul.mubr.msk.f32.vlgmr.msra.gmra.mxu1 %vm250_vm0, %v243_v45  ;;  %1311 = vmatprep.subr.mxu1 %v1636_v8 }
 0x182   : > { %1312 = vmatpush3.msra.mxu1 %v1636_v8  ;;  %1294 = vmatprep.mubr.msk.f32.mxu1 %vm250_vm0, %v244_v46  ;;  %v915_v8 = vadd.f32 %v914_v2, %v913_v58 }
 0x183   : > { %1313 = vmatprep.subr.mxu1 %v1641_v9  ;;  %v919_v11 = vpop.permute.xlu1 %918 }
 0x184   : > { %1314 = vmatpush3.msra.mxu1 %v1641_v9  ;;  %v936_v15 = vsel %vm500_vm1, %v1672_v31, %v919_v11 }
 0x185   : > { %1295 = vmatmul.mubr.msk.f32.gmra.mxu1 %vm250_vm0, %v245_v47 }
 0x186   : > { %1315 = vmatprep.mubr.msk.f32.mxu1 %vm250_vm0, %v1207_v48 }
 0x189   : > { %1316 = vmatmul.mubr.msk.f32.vlgmr.msra.gmra.mxu1 %vm250_vm0, %v1208_v49 }
 0x241   : > { %v1293_v56 = vpop.f32.mrf.mxu1 }
 0x242   : > { %v636_v57 = vmax.f32 %v1293_v56, 0.0 }
 0x243   : > { %v616_v59 = vpop.f32.mrf.mxu1 }
 0x244   : > { %v640_v60 = vmin.f32 %v636_v57, 1.0  ;;  %v635_v61 = vmax.f32 %v616_v59, 0.0 }
 0x245   : > { %v1296_v62 = vpop.f32.mrf.mxu1 }
 0x246   : > { %644 = vst [vmem:[%s1700_s30 + $0x8] sm:$0xff] %v640_v60  ;;  %v639_v0 = vmin.f32 %v635_v61, 1.0  ;;  %v638_v1 = vmax.f32 %v1296_v62, 0.0 }
 0x247   : > { %v626_v3 = vpop.f32.mrf.mxu1 }
 0x248   : > { %643 = vst [vmem:[%s1700_s30] sm:$0xff] %v639_v0  ;;  %v642_v4 = vmin.f32 %v638_v1, 1.0  ;;  %v637_v5 = vmax.f32 %v626_v3, 0.0 }
 0x249   : > { %v1317_v6 = vpop.f32.mrf.mxu1 }
 0x24a   : > { %646 = vst [vmem:[%s1700_s30 + $0x18] sm:$0xff] %v642_v4  ;;  %v641_v7 = vmin.f32 %v637_v5, 1.0  ;;  %928 = vrot.lane.b32.xlu0 %v1317_v6, %s1479_s26 }
 0x24b   : > { %v898_v9 = vpop.f32.mrf.mxu1 }
 0x24c   : > { %645 = vst [vmem:[%s1700_s30 + $0x10] sm:$0xff] %v641_v7  ;;  %926 = vrot.lane.b32.xlu1 %v898_v9, %s1479_s26 }
 0x24e   : > { %933 = vrot.lane.b32.xlu0 %v915_v8, %s1481_s28 }
 0x2bc   : > { %v929_v12 = vpop.permute.xlu0 %928 }
 0x2bd   : > { %v939_v16 = vsel %vm532_vm2, %v937_v14, %v929_v12 }
 0x2be   : > { %v927_v13 = vpop.permute.xlu1 %926 }
 0x2bf   : > { %v938_v17 = vsel %vm532_vm2, %v936_v15, %v927_v13 }
 0x2c0   : > { %v934_v18 = vpop.permute.xlu0 %933 }
 0x2c1   : > { %v941_v19 = vsel %vm535_vm3, %v939_v16, %v934_v18  ;;  %v940_v20 = vsel %vm535_vm3, %v938_v17, %v934_v18 }
 0x2c2   : > { %1318 = vmatprep.subr.mxu0 %v941_v19 }
 0x2c3   : > { %1319 = vmatpush3.msra.mxu0 %v941_v19 }
 0x2c4   : > { %1320 = vmatprep.subr.mxu0 %v940_v20 }
 0x2c5   : > { %1321 = vmatpush3.msra.mxu0 %v940_v20 }
 0x2c6   : > { %1323 = vmatmul.mubr.msk.f32.vlgmr.msra.gmra.mxu0 %vm250_vm0, %v1194_v21 }
 0x2c7   : > { %1325 = vmatprep.mubr.msk.f32.mxu0 %vm250_vm0, %v1195_v22 }
 0x2ca   : > { %1326 = vmatmul.mubr.msk.f32.gmra.mxu0 %vm250_vm0, %v1196_v23 }
 0x386   : > { %v1324_v24 = vpop.f32.mrf.mxu0 }
 0x387   : > { %v1040_v25 = vmax.f32 %v1324_v24, 0.0 }
 0x388   : > { %v1020_v26 = vpop.f32.mrf.mxu0 }
 0x389   : > { %v1044_v27 = vmin.f32 %v1040_v25, 1.0  ;;  %v1039_v28 = vmax.f32 %v1020_v26, 0.0 }
 0x38a   : > { %v1327_v29 = vpop.f32.mrf.mxu0 }
 0x38b   : > { %1216 = vst [vmem:[%s1700_s30 + $0x28] sm:$0xff] %v1044_v27  ;;  %v1043_v30 = vmin.f32 %v1039_v28, 1.0  ;;  %v1042_v31 = vmax.f32 %v1327_v29, 0.0 }
 0x38c   : > { %v1030_v32 = vpop.f32.mrf.mxu0 }
 0x38d   : > { %1215 = vst [vmem:[%s1700_s30 + $0x20] sm:$0xff] %v1043_v30  ;;  %v1046_v33 = vmin.f32 %v1042_v31, 1.0  ;;  %v1041_v34 = vmax.f32 %v1030_v32, 0.0 }
 0x38f   : > { %1218 = vst [vmem:[%s1700_s30 + $0x38] sm:$0xff] %v1046_v33  ;;  %v1045_v35 = vmin.f32 %v1041_v34, 1.0 }
 0x391   : > { %1217 = vst [vmem:[%s1700_s30 + $0x30] sm:$0xff] %v1045_v35 }
 0x392   : > { %1423 = shalt.err (!%p1420_p0)
}
 0x393   : > { %s1424_s19 = scalar_lea.hbm %s1733_s6, 1024  ;;  %s1428_s26 = scalar_lea.hbm %s1781_s3, 2048 }
 0x394   : > { %p1425_p2 = scmp.ne.s32.totalorder %s1733_s6, %s1424_s19  ;;  %p1429_p3 = scmp.lt.s32.totalorder %s1733_s6, %s1781_s3 }
 0x395   : > { %p1430_p6 = scmp.lt.s32.totalorder %s1428_s26, %s1424_s19 }
 0x396   : > { %p1426_p9 = pnand %p1425_p2, %p1790_p13 }
 0x397   : > { %p1431_p11 = por %p1430_p6, %p1429_p3 }
 0x398   : > { %p1427_p1 = pneg %p1426_p9 }
 0x39a   : > { %p1432_p12 = pnand %p1431_p11, %p1427_p1 }
 0x39c   : > { %1435 = shalt.err (!%p1432_p12)
}
 0x39d   : > { %s1483_s29 = smov 128   ;;  %s1484_s30 = smov 8  }
 0x39e   : > { %1331 = dma.vmem_to_hbm [thread:$0]  (%p1790_p13), %s1727_s9, 1024, %s1733_s6, %s1053_s7, %s1483_s29, %s1483_s29, %s1484_s30  }
 0x39f PF: > { %s1082_s10 = sand.u32 1, %s1462_s12   ;;  %p1791_p4 = scmp.ne.s32.totalorder %s1787_s25, 0 }
 0x3a0   : > { %p1792_p5 = scmp.ge.s32.totalorder %s1474_s15, 2  ;;  %s1083_s11 = scalar_lea.sflag [#allocation4], %s1082_s10 }
 0x3a2   : > { %p1338_p7 = pnand %p1792_p5, %p1791_p4 }
 0x3a4   : > { %p1339_p8 = pneg %p1338_p7 }
 0x3a6   : > { %1457 = dma.done.wait (%p1339_p8), %s1083_s11, 1024  }
 0x3a7   : > { %1459 = vsyncadd (%p1339_p8), %s1083_s11, 4294966272  ;;  %p16_p10 = scmp.ge.s32.totalorder %s1530_s18, 4   ;;  %s1793_s12 = smov %s1466_s13 }
 0x3a8   : > { %s1794_s13 = smov %s1470_s14  ;;  %s1795_s14 = smov %s1542_s21 }
 0x3a9   : > { %s1796_s15 = smov %s1530_s18  ;;  %18 = sbr.rel (!%p16_p10) target bundleno = 5 (0x5), region = 91 }
 0x3ae   :  { %1088 = vsyncpa [#allocation3], 1 }
 0x3af   :  { %1090 = vsyncpa [#allocation3 + $0x1], 1 }
 0x3b0   :  { %1091 = vsyncpa [#allocation4], 1 }
 0x3b1   :  { %1093 = vsyncpa [#allocation4 + $0x1], 1 }

</bundles_post_ra>
